<compile_context>
chip_gen: v5e
topology: v5e:2x2
jax: 0.10.0
libtpu: 0.0.40
codegen_flags: <defaults>
</compile_context>

<pallas_src>
import functools

import jax
import jax.numpy as jnp
from jax import lax
from jax.experimental import pallas as pl
from jax.experimental.pallas import tpu as pltpu

_LANE = 128
_SUBLANE = 8


def _sepconv2d_kernel(w_ref, xa_ref, xb_ref, o_ref, sh_ref, *, K, p, H, W,
                      out_h, out_w, chunk, row_blk):
    """2-in-channel -> 1-out-channel conv on one batch tile (batch on lanes).

    w_ref : (2*K*K,) float32 in SMEM, layout [channel, kh, kw] row-major.
    xa_ref: (H, W, TB) channel-0 tile, un-padded, batch last (lane axis).
    xb_ref: (H, W, TB) channel-1 tile.
    o_ref : (out_h, out_w, TB) output tile.
    sh_ref: (2*K, H+2p, out_w, chunk) f32 scratch: per (channel, kw) the
            kw-shifted, spatially zero-padded view for the current lane chunk.
    """
    tb = o_ref.shape[-1]
    Hp = H + 2 * p
    n_chunks = tb // chunk

    # Hoist all 2*K*K weight reads out of every loop (SMEM scalar reads, once).
    w = [[[w_ref[c * K * K + kh * K + kw] for kw in range(K)]
          for kh in range(K)] for c in range(2)]

    # Reset the zero-padded regions of the shifted-view scratch. Done every grid
    # step (cheap splat stores) so it is also correct when the "parallel" batch
    # axis is sharded across TensorCores (each core has private scratch and may
    # never execute grid step 0). The valid interiors are overwritten below.
    if p > 0:
        for idx in range(2 * K):
            sh_ref[idx] = jnp.zeros((Hp, out_w, chunk), jnp.float32)

    # Static chunk loop over the lane (batch) axis; all slice starts are static
    # multiples of `chunk`, so every load/store is a plain aligned access.
    for ci in range(n_chunks):
        b0 = ci * chunk

        # Build the K kw-shifted zero-padded views of both channels for this
        # lane chunk: only 2*K sublane-shifted copies (cast to f32 once here),
        # after which every tap below is a free leading-axis slice.
        for c, x_ref in enumerate((xa_ref, xb_ref)):
            for kw in range(K):
                dw = kw - p
                ow_lo = max(0, -dw)
                ow_hi = min(out_w, W - dw)
                if ow_hi > ow_lo:
                    sh_ref[c * K + kw, p:p + H, ow_lo:ow_hi, :] = (
                        x_ref[:, ow_lo + dw:ow_hi + dw,
                              b0:b0 + chunk].astype(jnp.float32))

        # Unrolled 2*K*K-tap FMA with a register-resident f32 accumulator,
        # processed in small output-row groups to bound live vregs.
        for r0 in range(0, out_h, row_blk):
            rows = min(row_blk, out_h - r0)
            acc = jnp.zeros((rows, out_w, chunk), jnp.float32)
            for c in range(2):
                for kh in range(K):
                    for kw in range(K):
                        src = sh_ref[c * K + kw, r0 + kh:r0 + kh + rows, :, :]
                        acc = acc + w[c][kh][kw] * src
            o_ref[r0:r0 + rows, :, b0:b0 + chunk] = acc.astype(o_ref.dtype)


def sep_conv2d_forward(x0, x1, x2, rel, weight, *, n, emb_s, kernel_size,
                       padding, block_b=2048):
    """Pallas implementation of SepConv2d.forward.

    x0, x1, x2: (B, 1, emb_s) arrays; weight: (1, 2, K, K); rel is unused.
    Returns (B, 1, emb_s).
    """
    del rel  # unused by the reference forward pass
    K, p = kernel_size, padding

    # Channel selection (replaces torch.cat; avoids materializing the concat).
    if n == 0:
        xa, xb = x1, x2
    elif n == 1:
        xa, xb = x0, x2
    else:
        xa, xb = x0, x1

    B = xa.shape[0]
    assert emb_s % 10 == 0
    H, W = emb_s // 10, 10
    Hp, Wp = H + 2 * p, W + 2 * p
    out_h = Hp - K + 1
    out_w = Wp - K + 1
    # The module's final .view(-1, 1, emb_s) implies a 'same'-size conv.
    assert out_h * out_w == emb_s, "kernel_size/padding must preserve emb_s"

    # Lane-dense layout: batch on the last (lane) axis. This transpose is pure
    # layout plumbing; padding / batch-pad passes over HBM are eliminated.
    xa_t = jnp.transpose(xa.reshape(B, H, W), (1, 2, 0))
    xb_t = jnp.transpose(xb.reshape(B, H, W), (1, 2, 0))
    w_flat = weight.reshape(-1).astype(jnp.float32)  # (2*K*K,) -> SMEM

    # Batch tiling on the lane axis (128-granule). Try to produce >= 2 grid
    # steps so both v7x TensorCores receive work; ragged last tile is handled
    # by Pallas OOB masking (no batch padding, no output slice).
    if B <= _LANE:
        tb = B
    else:
        tb = max(_LANE, (min(block_b, B) // _LANE) * _LANE)
        if tb >= B:
            tb = max(_LANE, (((B + 1) // 2) // _LANE) * _LANE)
    n_tiles = pl.cdiv(B, tb)

    # Inner lane-chunking + output-row grouping so the accumulator stays
    # register-resident (~<= 16 f32 vregs) across all 2*K*K taps.
    if tb <= _LANE:
        chunk = tb
    elif tb % 256 == 0:
        chunk = 256
    else:
        chunk = _LANE
    w_sub_tiles = -(-out_w // _SUBLANE)
    row_blk = max(1, (16 * _LANE) // (w_sub_tiles * max(chunk, _LANE)))
    row_blk = min(row_blk, out_h)

    itemsize = jnp.dtype(xa.dtype).itemsize
    cost = pl.CostEstimate(
        flops=2 * B * out_h * out_w * 2 * K * K,
        transcendentals=0,
        bytes_accessed=(2 * B * H * W + B * out_h * out_w) * itemsize
        + w_flat.size * 4,
    )

    kernel = functools.partial(
        _sepconv2d_kernel, K=K, p=p, H=H, W=W, out_h=out_h, out_w=out_w,
        chunk=chunk, row_blk=row_blk)

    out = pl.pallas_call(
        kernel,
        out_shape=jax.ShapeDtypeStruct((out_h, out_w, B), xa.dtype),
        grid=(n_tiles,),
        in_specs=[
            pl.BlockSpec(memory_space=pltpu.MemorySpace.SMEM),   # conv weights
            pl.BlockSpec((H, W, tb), lambda i: (0, 0, i)),       # channel 0
            pl.BlockSpec((H, W, tb), lambda i: (0, 0, i)),       # channel 1
        ],
        out_specs=pl.BlockSpec((out_h, out_w, tb), lambda i: (0, 0, i)),
        scratch_shapes=[pltpu.VMEM((2 * K, Hp, out_w, chunk), jnp.float32)],
        compiler_params=pltpu.CompilerParams(
            dimension_semantics=("parallel",),
        ),
        cost_estimate=cost,
    )(w_flat, xa_t, xb_t)

    # Back to the module's (B, 1, emb_s) layout.
    return jnp.transpose(out, (2, 0, 1)).reshape(B, 1, emb_s)


if __name__ == "__main__":
    # Small deterministic example consistent with the module:
    # emb_s divisible by 10, 'same' conv (K=3, padding=1).
    emb_s = 40
    batch = 8
    K = 3
    pad = 1
    n = 2  # -> x = cat([x0, x1], 1)

    key = jax.random.PRNGKey(0)
    k0, k1, k2, kw, kr = jax.random.split(key, 5)
    x0 = jax.random.normal(k0, (batch, 1, emb_s), dtype=jnp.float32)
    x1 = jax.random.normal(k1, (batch, 1, emb_s), dtype=jnp.float32)
    x2 = jax.random.normal(k2, (batch, 1, emb_s), dtype=jnp.float32)
    weight = jax.random.normal(kw, (1, 2, K, K), dtype=jnp.float32) * 0.1
    rel = jax.random.randint(kr, (batch,), 0, 10)  # unused, mirrors the API

    out = sep_conv2d_forward(x0, x1, x2, rel, weight, n=n, emb_s=emb_s,
                             kernel_size=K, padding=pad)
    out = jax.block_until_ready(out)

    # Reference in plain JAX (same semantics as torch Conv2d, NCHW/OIHW,
    # stride 1, no bias), including the cat / view plumbing.
    x_ref = jnp.concatenate([x0, x1], axis=1).reshape(batch, 2, emb_s // 10, 10)
    ref = lax.conv_general_dilated(
        x_ref, weight, window_strides=(1, 1),
        padding=[(pad, pad), (pad, pad)],
        dimension_numbers=("NCHW", "OIHW", "NCHW"),
    ).reshape(batch, 1, emb_s)

    assert out.shape == (batch, 1, emb_s)
    assert jnp.allclose(out, ref, atol=1e-5, rtol=1e-5)

    print("KERNEL_OK")
</pallas_src>

<mosaic_0001>
module attributes {stable_mosaic.version = 11 : i64} {
  func.func @_sepconv2d_kernel(%arg0: i32, %arg1: memref<18xf32, #tpu.memory_space<smem>>, %arg2: memref<4x10x8xf32, #tpu.memory_space<vmem>>, %arg3: memref<4x10x8xf32, #tpu.memory_space<vmem>>, %arg4: memref<4x10x8xf32, #tpu.memory_space<vmem>>, %arg5: memref<6x6x10x8xf32, #tpu.memory_space<vmem>>) attributes {dimension_semantics = [#tpu.dimension_semantics<parallel>], iteration_bounds = array<i64: 1>, scalar_prefetch = 0 : i64, scratch_operands = 1 : i64, tpu.core_type = #tpu.core_type<tc>, window_params = [{transform_indices = @transform_0, window_bounds = array<i64: 18>}, {transform_indices = @transform_1, window_bounds = array<i64: 4, 10, 8>}, {transform_indices = @transform_2, window_bounds = array<i64: 4, 10, 8>}, {transform_indices = @transform_3, window_bounds = array<i64: 4, 10, 8>}]} {
    %c0 = arith.constant 0 : index
    %0 = memref.load %arg1[%c0] : memref<18xf32, #tpu.memory_space<smem>>
    %c1 = arith.constant 1 : index
    %1 = memref.load %arg1[%c1] : memref<18xf32, #tpu.memory_space<smem>>
    %c2 = arith.constant 2 : index
    %2 = memref.load %arg1[%c2] : memref<18xf32, #tpu.memory_space<smem>>
    %c3 = arith.constant 3 : index
    %3 = memref.load %arg1[%c3] : memref<18xf32, #tpu.memory_space<smem>>
    %c4 = arith.constant 4 : index
    %4 = memref.load %arg1[%c4] : memref<18xf32, #tpu.memory_space<smem>>
    %c5 = arith.constant 5 : index
    %5 = memref.load %arg1[%c5] : memref<18xf32, #tpu.memory_space<smem>>
    %c6 = arith.constant 6 : index
    %6 = memref.load %arg1[%c6] : memref<18xf32, #tpu.memory_space<smem>>
    %c7 = arith.constant 7 : index
    %7 = memref.load %arg1[%c7] : memref<18xf32, #tpu.memory_space<smem>>
    %c8 = arith.constant 8 : index
    %8 = memref.load %arg1[%c8] : memref<18xf32, #tpu.memory_space<smem>>
    %c9 = arith.constant 9 : index
    %9 = memref.load %arg1[%c9] : memref<18xf32, #tpu.memory_space<smem>>
    %c10 = arith.constant 10 : index
    %10 = memref.load %arg1[%c10] : memref<18xf32, #tpu.memory_space<smem>>
    %c11 = arith.constant 11 : index
    %11 = memref.load %arg1[%c11] : memref<18xf32, #tpu.memory_space<smem>>
    %c12 = arith.constant 12 : index
    %12 = memref.load %arg1[%c12] : memref<18xf32, #tpu.memory_space<smem>>
    %c13 = arith.constant 13 : index
    %13 = memref.load %arg1[%c13] : memref<18xf32, #tpu.memory_space<smem>>
    %c14 = arith.constant 14 : index
    %14 = memref.load %arg1[%c14] : memref<18xf32, #tpu.memory_space<smem>>
    %c15 = arith.constant 15 : index
    %15 = memref.load %arg1[%c15] : memref<18xf32, #tpu.memory_space<smem>>
    %c16 = arith.constant 16 : index
    %16 = memref.load %arg1[%c16] : memref<18xf32, #tpu.memory_space<smem>>
    %c17 = arith.constant 17 : index
    %17 = memref.load %arg1[%c17] : memref<18xf32, #tpu.memory_space<smem>>
    %cst = arith.constant 0.000000e+00 : f32
    %18 = vector.broadcast %cst : f32 to vector<6x10x8xf32>
    %c0_0 = arith.constant 0 : index
    %c0_1 = arith.constant 0 : index
    %c0_2 = arith.constant 0 : index
    %c0_3 = arith.constant 0 : index
    %19 = vector.load %arg5[%c0_0, %c0_1, %c0_2, %c0_3] : memref<6x6x10x8xf32, #tpu.memory_space<vmem>>, vector<1x6x10x8xf32>
    %20 = vector.shape_cast %19 : vector<1x6x10x8xf32> to vector<6x10x8xf32>
    %21 = vector.shape_cast %18 : vector<6x10x8xf32> to vector<1x6x10x8xf32>
    tpu.vector_store %arg5[%c0_0, %c0_1, %c0_2, %c0_3], %21 {strides = array<i32>} : memref<6x6x10x8xf32, #tpu.memory_space<vmem>>, vector<1x6x10x8xf32>,
    %cst_4 = arith.constant 0.000000e+00 : f32
    %22 = vector.broadcast %cst_4 : f32 to vector<6x10x8xf32>
    %c1_5 = arith.constant 1 : index
    %c0_6 = arith.constant 0 : index
    %c0_7 = arith.constant 0 : index
    %c0_8 = arith.constant 0 : index
    %23 = vector.load %arg5[%c1_5, %c0_6, %c0_7, %c0_8] : memref<6x6x10x8xf32, #tpu.memory_space<vmem>>, vector<1x6x10x8xf32>
    %24 = vector.shape_cast %23 : vector<1x6x10x8xf32> to vector<6x10x8xf32>
    %25 = vector.shape_cast %22 : vector<6x10x8xf32> to vector<1x6x10x8xf32>
    tpu.vector_store %arg5[%c1_5, %c0_6, %c0_7, %c0_8], %25 {strides = array<i32>} : memref<6x6x10x8xf32, #tpu.memory_space<vmem>>, vector<1x6x10x8xf32>,
    %cst_9 = arith.constant 0.000000e+00 : f32
    %26 = vector.broadcast %cst_9 : f32 to vector<6x10x8xf32>
    %c2_10 = arith.constant 2 : index
    %c0_11 = arith.constant 0 : index
    %c0_12 = arith.constant 0 : index
    %c0_13 = arith.constant 0 : index
    %27 = vector.load %arg5[%c2_10, %c0_11, %c0_12, %c0_13] : memref<6x6x10x8xf32, #tpu.memory_space<vmem>>, vector<1x6x10x8xf32>
    %28 = vector.shape_cast %27 : vector<1x6x10x8xf32> to vector<6x10x8xf32>
    %29 = vector.shape_cast %26 : vector<6x10x8xf32> to vector<1x6x10x8xf32>
    tpu.vector_store %arg5[%c2_10, %c0_11, %c0_12, %c0_13], %29 {strides = array<i32>} : memref<6x6x10x8xf32, #tpu.memory_space<vmem>>, vector<1x6x10x8xf32>,
    %cst_14 = arith.constant 0.000000e+00 : f32
    %30 = vector.broadcast %cst_14 : f32 to vector<6x10x8xf32>
    %c3_15 = arith.constant 3 : index
    %c0_16 = arith.constant 0 : index
    %c0_17 = arith.constant 0 : index
    %c0_18 = arith.constant 0 : index
    %31 = vector.load %arg5[%c3_15, %c0_16, %c0_17, %c0_18] : memref<6x6x10x8xf32, #tpu.memory_space<vmem>>, vector<1x6x10x8xf32>
    %32 = vector.shape_cast %31 : vector<1x6x10x8xf32> to vector<6x10x8xf32>
    %33 = vector.shape_cast %30 : vector<6x10x8xf32> to vector<1x6x10x8xf32>
    tpu.vector_store %arg5[%c3_15, %c0_16, %c0_17, %c0_18], %33 {strides = array<i32>} : memref<6x6x10x8xf32, #tpu.memory_space<vmem>>, vector<1x6x10x8xf32>,
    %cst_19 = arith.constant 0.000000e+00 : f32
    %34 = vector.broadcast %cst_19 : f32 to vector<6x10x8xf32>
    %c4_20 = arith.constant 4 : index
    %c0_21 = arith.constant 0 : index
    %c0_22 = arith.constant 0 : index
    %c0_23 = arith.constant 0 : index
    %35 = vector.load %arg5[%c4_20, %c0_21, %c0_22, %c0_23] : memref<6x6x10x8xf32, #tpu.memory_space<vmem>>, vector<1x6x10x8xf32>
    %36 = vector.shape_cast %35 : vector<1x6x10x8xf32> to vector<6x10x8xf32>
    %37 = vector.shape_cast %34 : vector<6x10x8xf32> to vector<1x6x10x8xf32>
    tpu.vector_store %arg5[%c4_20, %c0_21, %c0_22, %c0_23], %37 {strides = array<i32>} : memref<6x6x10x8xf32, #tpu.memory_space<vmem>>, vector<1x6x10x8xf32>,
    %cst_24 = arith.constant 0.000000e+00 : f32
    %38 = vector.broadcast %cst_24 : f32 to vector<6x10x8xf32>
    %c5_25 = arith.constant 5 : index
    %c0_26 = arith.constant 0 : index
    %c0_27 = arith.constant 0 : index
    %c0_28 = arith.constant 0 : index
    %39 = vector.load %arg5[%c5_25, %c0_26, %c0_27, %c0_28] : memref<6x6x10x8xf32, #tpu.memory_space<vmem>>, vector<1x6x10x8xf32>
    %40 = vector.shape_cast %39 : vector<1x6x10x8xf32> to vector<6x10x8xf32>
    %41 = vector.shape_cast %38 : vector<6x10x8xf32> to vector<1x6x10x8xf32>
    tpu.vector_store %arg5[%c5_25, %c0_26, %c0_27, %c0_28], %41 {strides = array<i32>} : memref<6x6x10x8xf32, #tpu.memory_space<vmem>>, vector<1x6x10x8xf32>,
    %c0_29 = arith.constant 0 : index
    %c0_30 = arith.constant 0 : index
    %c0_31 = arith.constant 0 : index
    %42 = vector.load %arg2[%c0_29, %c0_30, %c0_31] : memref<4x10x8xf32, #tpu.memory_space<vmem>>, vector<4x9x8xf32>
    %c0_32 = arith.constant 0 : index
    %c1_33 = arith.constant 1 : index
    %c1_34 = arith.constant 1 : index
    %c0_35 = arith.constant 0 : index
    %43 = vector.load %arg5[%c0_32, %c1_33, %c1_34, %c0_35] : memref<6x6x10x8xf32, #tpu.memory_space<vmem>>, vector<1x4x9x8xf32>
    %44 = vector.shape_cast %43 : vector<1x4x9x8xf32> to vector<4x9x8xf32>
    %45 = vector.shape_cast %42 : vector<4x9x8xf32> to vector<1x4x9x8xf32>
    tpu.vector_store %arg5[%c0_32, %c1_33, %c1_34, %c0_35], %45 {strides = array<i32>} : memref<6x6x10x8xf32, #tpu.memory_space<vmem>>, vector<1x4x9x8xf32>,
    %c0_36 = arith.constant 0 : index
    %c0_37 = arith.constant 0 : index
    %c0_38 = arith.constant 0 : index
    %46 = vector.load %arg2[%c0_36, %c0_37, %c0_38] : memref<4x10x8xf32, #tpu.memory_space<vmem>>, vector<4x10x8xf32>
    %c1_39 = arith.constant 1 : index
    %c1_40 = arith.constant 1 : index
    %c0_41 = arith.constant 0 : index
    %c0_42 = arith.constant 0 : index
    %47 = vector.load %arg5[%c1_39, %c1_40, %c0_41, %c0_42] : memref<6x6x10x8xf32, #tpu.memory_space<vmem>>, vector<1x4x10x8xf32>
    %48 = vector.shape_cast %47 : vector<1x4x10x8xf32> to vector<4x10x8xf32>
    %49 = vector.shape_cast %46 : vector<4x10x8xf32> to vector<1x4x10x8xf32>
    tpu.vector_store %arg5[%c1_39, %c1_40, %c0_41, %c0_42], %49 {strides = array<i32>} : memref<6x6x10x8xf32, #tpu.memory_space<vmem>>, vector<1x4x10x8xf32>,
    %c0_43 = arith.constant 0 : index
    %c1_44 = arith.constant 1 : index
    %c0_45 = arith.constant 0 : index
    %50 = vector.load %arg2[%c0_43, %c1_44, %c0_45] : memref<4x10x8xf32, #tpu.memory_space<vmem>>, vector<4x9x8xf32>
    %c2_46 = arith.constant 2 : index
    %c1_47 = arith.constant 1 : index
    %c0_48 = arith.constant 0 : index
    %c0_49 = arith.constant 0 : index
    %51 = vector.load %arg5[%c2_46, %c1_47, %c0_48, %c0_49] : memref<6x6x10x8xf32, #tpu.memory_space<vmem>>, vector<1x4x9x8xf32>
    %52 = vector.shape_cast %51 : vector<1x4x9x8xf32> to vector<4x9x8xf32>
    %53 = vector.shape_cast %50 : vector<4x9x8xf32> to vector<1x4x9x8xf32>
    tpu.vector_store %arg5[%c2_46, %c1_47, %c0_48, %c0_49], %53 {strides = array<i32>} : memref<6x6x10x8xf32, #tpu.memory_space<vmem>>, vector<1x4x9x8xf32>,
    %c0_50 = arith.constant 0 : index
    %c0_51 = arith.constant 0 : index
    %c0_52 = arith.constant 0 : index
    %54 = vector.load %arg3[%c0_50, %c0_51, %c0_52] : memref<4x10x8xf32, #tpu.memory_space<vmem>>, vector<4x9x8xf32>
    %c3_53 = arith.constant 3 : index
    %c1_54 = arith.constant 1 : index
    %c1_55 = arith.constant 1 : index
    %c0_56 = arith.constant 0 : index
    %55 = vector.load %arg5[%c3_53, %c1_54, %c1_55, %c0_56] : memref<6x6x10x8xf32, #tpu.memory_space<vmem>>, vector<1x4x9x8xf32>
    %56 = vector.shape_cast %55 : vector<1x4x9x8xf32> to vector<4x9x8xf32>
    %57 = vector.shape_cast %54 : vector<4x9x8xf32> to vector<1x4x9x8xf32>
    tpu.vector_store %arg5[%c3_53, %c1_54, %c1_55, %c0_56], %57 {strides = array<i32>} : memref<6x6x10x8xf32, #tpu.memory_space<vmem>>, vector<1x4x9x8xf32>,
    %c0_57 = arith.constant 0 : index
    %c0_58 = arith.constant 0 : index
    %c0_59 = arith.constant 0 : index
    %58 = vector.load %arg3[%c0_57, %c0_58, %c0_59] : memref<4x10x8xf32, #tpu.memory_space<vmem>>, vector<4x10x8xf32>
    %c4_60 = arith.constant 4 : index
    %c1_61 = arith.constant 1 : index
    %c0_62 = arith.constant 0 : index
    %c0_63 = arith.constant 0 : index
    %59 = vector.load %arg5[%c4_60, %c1_61, %c0_62, %c0_63] : memref<6x6x10x8xf32, #tpu.memory_space<vmem>>, vector<1x4x10x8xf32>
    %60 = vector.shape_cast %59 : vector<1x4x10x8xf32> to vector<4x10x8xf32>
    %61 = vector.shape_cast %58 : vector<4x10x8xf32> to vector<1x4x10x8xf32>
    tpu.vector_store %arg5[%c4_60, %c1_61, %c0_62, %c0_63], %61 {strides = array<i32>} : memref<6x6x10x8xf32, #tpu.memory_space<vmem>>, vector<1x4x10x8xf32>,
    %c0_64 = arith.constant 0 : index
    %c1_65 = arith.constant 1 : index
    %c0_66 = arith.constant 0 : index
    %62 = vector.load %arg3[%c0_64, %c1_65, %c0_66] : memref<4x10x8xf32, #tpu.memory_space<vmem>>, vector<4x9x8xf32>
    %c5_67 = arith.constant 5 : index
    %c1_68 = arith.constant 1 : index
    %c0_69 = arith.constant 0 : index
    %c0_70 = arith.constant 0 : index
    %63 = vector.load %arg5[%c5_67, %c1_68, %c0_69, %c0_70] : memref<6x6x10x8xf32, #tpu.memory_space<vmem>>, vector<1x4x9x8xf32>
    %64 = vector.shape_cast %63 : vector<1x4x9x8xf32> to vector<4x9x8xf32>
    %65 = vector.shape_cast %62 : vector<4x9x8xf32> to vector<1x4x9x8xf32>
    tpu.vector_store %arg5[%c5_67, %c1_68, %c0_69, %c0_70], %65 {strides = array<i32>} : memref<6x6x10x8xf32, #tpu.memory_space<vmem>>, vector<1x4x9x8xf32>,
    %cst_71 = arith.constant 0.000000e+00 : f32
    %66 = vector.broadcast %cst_71 : f32 to vector<4x10x8xf32>
    %c0_72 = arith.constant 0 : index
    %c0_73 = arith.constant 0 : index
    %c0_74 = arith.constant 0 : index
    %c0_75 = arith.constant 0 : index
    %67 = vector.load %arg5[%c0_72, %c0_73, %c0_74, %c0_75] : memref<6x6x10x8xf32, #tpu.memory_space<vmem>>, vector<1x4x10x8xf32>
    %68 = vector.shape_cast %67 : vector<1x4x10x8xf32> to vector<4x10x8xf32>
    %69 = vector.broadcast %0 : f32 to vector<4x10x8xf32>
    %70 = arith.mulf %69, %68 : vector<4x10x8xf32>
    %71 = arith.addf %66, %70 : vector<4x10x8xf32>
    %c1_76 = arith.constant 1 : index
    %c0_77 = arith.constant 0 : index
    %c0_78 = arith.constant 0 : index
    %c0_79 = arith.constant 0 : index
    %72 = vector.load %arg5[%c1_76, %c0_77, %c0_78, %c0_79] : memref<6x6x10x8xf32, #tpu.memory_space<vmem>>, vector<1x4x10x8xf32>
    %73 = vector.shape_cast %72 : vector<1x4x10x8xf32> to vector<4x10x8xf32>
    %74 = vector.broadcast %1 : f32 to vector<4x10x8xf32>
    %75 = arith.mulf %74, %73 : vector<4x10x8xf32>
    %76 = arith.addf %71, %75 : vector<4x10x8xf32>
    %c2_80 = arith.constant 2 : index
    %c0_81 = arith.constant 0 : index
    %c0_82 = arith.constant 0 : index
    %c0_83 = arith.constant 0 : index
    %77 = vector.load %arg5[%c2_80, %c0_81, %c0_82, %c0_83] : memref<6x6x10x8xf32, #tpu.memory_space<vmem>>, vector<1x4x10x8xf32>
    %78 = vector.shape_cast %77 : vector<1x4x10x8xf32> to vector<4x10x8xf32>
    %79 = vector.broadcast %2 : f32 to vector<4x10x8xf32>
    %80 = arith.mulf %79, %78 : vector<4x10x8xf32>
    %81 = arith.addf %76, %80 : vector<4x10x8xf32>
    %c0_84 = arith.constant 0 : index
    %c1_85 = arith.constant 1 : index
    %c0_86 = arith.constant 0 : index
    %c0_87 = arith.constant 0 : index
    %82 = vector.load %arg5[%c0_84, %c1_85, %c0_86, %c0_87] : memref<6x6x10x8xf32, #tpu.memory_space<vmem>>, vector<1x4x10x8xf32>
    %83 = vector.shape_cast %82 : vector<1x4x10x8xf32> to vector<4x10x8xf32>
    %84 = vector.broadcast %3 : f32 to vector<4x10x8xf32>
    %85 = arith.mulf %84, %83 : vector<4x10x8xf32>
    %86 = arith.addf %81, %85 : vector<4x10x8xf32>
    %c1_88 = arith.constant 1 : index
    %c1_89 = arith.constant 1 : index
    %c0_90 = arith.constant 0 : index
    %c0_91 = arith.constant 0 : index
    %87 = vector.load %arg5[%c1_88, %c1_89, %c0_90, %c0_91] : memref<6x6x10x8xf32, #tpu.memory_space<vmem>>, vector<1x4x10x8xf32>
    %88 = vector.shape_cast %87 : vector<1x4x10x8xf32> to vector<4x10x8xf32>
    %89 = vector.broadcast %4 : f32 to vector<4x10x8xf32>
    %90 = arith.mulf %89, %88 : vector<4x10x8xf32>
    %91 = arith.addf %86, %90 : vector<4x10x8xf32>
    %c2_92 = arith.constant 2 : index
    %c1_93 = arith.constant 1 : index
    %c0_94 = arith.constant 0 : index
    %c0_95 = arith.constant 0 : index
    %92 = vector.load %arg5[%c2_92, %c1_93, %c0_94, %c0_95] : memref<6x6x10x8xf32, #tpu.memory_space<vmem>>, vector<1x4x10x8xf32>
    %93 = vector.shape_cast %92 : vector<1x4x10x8xf32> to vector<4x10x8xf32>
    %94 = vector.broadcast %5 : f32 to vector<4x10x8xf32>
    %95 = arith.mulf %94, %93 : vector<4x10x8xf32>
    %96 = arith.addf %91, %95 : vector<4x10x8xf32>
    %c0_96 = arith.constant 0 : index
    %c2_97 = arith.constant 2 : index
    %c0_98 = arith.constant 0 : index
    %c0_99 = arith.constant 0 : index
    %97 = vector.load %arg5[%c0_96, %c2_97, %c0_98, %c0_99] : memref<6x6x10x8xf32, #tpu.memory_space<vmem>>, vector<1x4x10x8xf32>
    %98 = vector.shape_cast %97 : vector<1x4x10x8xf32> to vector<4x10x8xf32>
    %99 = vector.broadcast %6 : f32 to vector<4x10x8xf32>
    %100 = arith.mulf %99, %98 : vector<4x10x8xf32>
    %101 = arith.addf %96, %100 : vector<4x10x8xf32>
    %c1_100 = arith.constant 1 : index
    %c2_101 = arith.constant 2 : index
    %c0_102 = arith.constant 0 : index
    %c0_103 = arith.constant 0 : index
    %102 = vector.load %arg5[%c1_100, %c2_101, %c0_102, %c0_103] : memref<6x6x10x8xf32, #tpu.memory_space<vmem>>, vector<1x4x10x8xf32>
    %103 = vector.shape_cast %102 : vector<1x4x10x8xf32> to vector<4x10x8xf32>
    %104 = vector.broadcast %7 : f32 to vector<4x10x8xf32>
    %105 = arith.mulf %104, %103 : vector<4x10x8xf32>
    %106 = arith.addf %101, %105 : vector<4x10x8xf32>
    %c2_104 = arith.constant 2 : index
    %c2_105 = arith.constant 2 : index
    %c0_106 = arith.constant 0 : index
    %c0_107 = arith.constant 0 : index
    %107 = vector.load %arg5[%c2_104, %c2_105, %c0_106, %c0_107] : memref<6x6x10x8xf32, #tpu.memory_space<vmem>>, vector<1x4x10x8xf32>
    %108 = vector.shape_cast %107 : vector<1x4x10x8xf32> to vector<4x10x8xf32>
    %109 = vector.broadcast %8 : f32 to vector<4x10x8xf32>
    %110 = arith.mulf %109, %108 : vector<4x10x8xf32>
    %111 = arith.addf %106, %110 : vector<4x10x8xf32>
    %c3_108 = arith.constant 3 : index
    %c0_109 = arith.constant 0 : index
    %c0_110 = arith.constant 0 : index
    %c0_111 = arith.constant 0 : index
    %112 = vector.load %arg5[%c3_108, %c0_109, %c0_110, %c0_111] : memref<6x6x10x8xf32, #tpu.memory_space<vmem>>, vector<1x4x10x8xf32>
    %113 = vector.shape_cast %112 : vector<1x4x10x8xf32> to vector<4x10x8xf32>
    %114 = vector.broadcast %9 : f32 to vector<4x10x8xf32>
    %115 = arith.mulf %114, %113 : vector<4x10x8xf32>
    %116 = arith.addf %111, %115 : vector<4x10x8xf32>
    %c4_112 = arith.constant 4 : index
    %c0_113 = arith.constant 0 : index
    %c0_114 = arith.constant 0 : index
    %c0_115 = arith.constant 0 : index
    %117 = vector.load %arg5[%c4_112, %c0_113, %c0_114, %c0_115] : memref<6x6x10x8xf32, #tpu.memory_space<vmem>>, vector<1x4x10x8xf32>
    %118 = vector.shape_cast %117 : vector<1x4x10x8xf32> to vector<4x10x8xf32>
    %119 = vector.broadcast %10 : f32 to vector<4x10x8xf32>
    %120 = arith.mulf %119, %118 : vector<4x10x8xf32>
    %121 = arith.addf %116, %120 : vector<4x10x8xf32>
    %c5_116 = arith.constant 5 : index
    %c0_117 = arith.constant 0 : index
    %c0_118 = arith.constant 0 : index
    %c0_119 = arith.constant 0 : index
    %122 = vector.load %arg5[%c5_116, %c0_117, %c0_118, %c0_119] : memref<6x6x10x8xf32, #tpu.memory_space<vmem>>, vector<1x4x10x8xf32>
    %123 = vector.shape_cast %122 : vector<1x4x10x8xf32> to vector<4x10x8xf32>
    %124 = vector.broadcast %11 : f32 to vector<4x10x8xf32>
    %125 = arith.mulf %124, %123 : vector<4x10x8xf32>
    %126 = arith.addf %121, %125 : vector<4x10x8xf32>
    %c3_120 = arith.constant 3 : index
    %c1_121 = arith.constant 1 : index
    %c0_122 = arith.constant 0 : index
    %c0_123 = arith.constant 0 : index
    %127 = vector.load %arg5[%c3_120, %c1_121, %c0_122, %c0_123] : memref<6x6x10x8xf32, #tpu.memory_space<vmem>>, vector<1x4x10x8xf32>
    %128 = vector.shape_cast %127 : vector<1x4x10x8xf32> to vector<4x10x8xf32>
    %129 = vector.broadcast %12 : f32 to vector<4x10x8xf32>
    %130 = arith.mulf %129, %128 : vector<4x10x8xf32>
    %131 = arith.addf %126, %130 : vector<4x10x8xf32>
    %c4_124 = arith.constant 4 : index
    %c1_125 = arith.constant 1 : index
    %c0_126 = arith.constant 0 : index
    %c0_127 = arith.constant 0 : index
    %132 = vector.load %arg5[%c4_124, %c1_125, %c0_126, %c0_127] : memref<6x6x10x8xf32, #tpu.memory_space<vmem>>, vector<1x4x10x8xf32>
    %133 = vector.shape_cast %132 : vector<1x4x10x8xf32> to vector<4x10x8xf32>
    %134 = vector.broadcast %13 : f32 to vector<4x10x8xf32>
    %135 = arith.mulf %134, %133 : vector<4x10x8xf32>
    %136 = arith.addf %131, %135 : vector<4x10x8xf32>
    %c5_128 = arith.constant 5 : index
    %c1_129 = arith.constant 1 : index
    %c0_130 = arith.constant 0 : index
    %c0_131 = arith.constant 0 : index
    %137 = vector.load %arg5[%c5_128, %c1_129, %c0_130, %c0_131] : memref<6x6x10x8xf32, #tpu.memory_space<vmem>>, vector<1x4x10x8xf32>
    %138 = vector.shape_cast %137 : vector<1x4x10x8xf32> to vector<4x10x8xf32>
    %139 = vector.broadcast %14 : f32 to vector<4x10x8xf32>
    %140 = arith.mulf %139, %138 : vector<4x10x8xf32>
    %141 = arith.addf %136, %140 : vector<4x10x8xf32>
    %c3_132 = arith.constant 3 : index
    %c2_133 = arith.constant 2 : index
    %c0_134 = arith.constant 0 : index
    %c0_135 = arith.constant 0 : index
    %142 = vector.load %arg5[%c3_132, %c2_133, %c0_134, %c0_135] : memref<6x6x10x8xf32, #tpu.memory_space<vmem>>, vector<1x4x10x8xf32>
    %143 = vector.shape_cast %142 : vector<1x4x10x8xf32> to vector<4x10x8xf32>
    %144 = vector.broadcast %15 : f32 to vector<4x10x8xf32>
    %145 = arith.mulf %144, %143 : vector<4x10x8xf32>
    %146 = arith.addf %141, %145 : vector<4x10x8xf32>
    %c4_136 = arith.constant 4 : index
    %c2_137 = arith.constant 2 : index
    %c0_138 = arith.constant 0 : index
    %c0_139 = arith.constant 0 : index
    %147 = vector.load %arg5[%c4_136, %c2_137, %c0_138, %c0_139] : memref<6x6x10x8xf32, #tpu.memory_space<vmem>>, vector<1x4x10x8xf32>
    %148 = vector.shape_cast %147 : vector<1x4x10x8xf32> to vector<4x10x8xf32>
    %149 = vector.broadcast %16 : f32 to vector<4x10x8xf32>
    %150 = arith.mulf %149, %148 : vector<4x10x8xf32>
    %151 = arith.addf %146, %150 : vector<4x10x8xf32>
    %c5_140 = arith.constant 5 : index
    %c2_141 = arith.constant 2 : index
    %c0_142 = arith.constant 0 : index
    %c0_143 = arith.constant 0 : index
    %152 = vector.load %arg5[%c5_140, %c2_141, %c0_142, %c0_143] : memref<6x6x10x8xf32, #tpu.memory_space<vmem>>, vector<1x4x10x8xf32>
    %153 = vector.shape_cast %152 : vector<1x4x10x8xf32> to vector<4x10x8xf32>
    %154 = vector.broadcast %17 : f32 to vector<4x10x8xf32>
    %155 = arith.mulf %154, %153 : vector<4x10x8xf32>
    %156 = arith.addf %151, %155 : vector<4x10x8xf32>
    %c0_144 = arith.constant 0 : index
    %c0_145 = arith.constant 0 : index
    %c0_146 = arith.constant 0 : index
    %157 = vector.load %arg4[%c0_144, %c0_145, %c0_146] : memref<4x10x8xf32, #tpu.memory_space<vmem>>, vector<4x10x8xf32>
    tpu.vector_store %arg4[%c0_144, %c0_145, %c0_146], %156 {strides = array<i32>} : memref<4x10x8xf32, #tpu.memory_space<vmem>>, vector<4x10x8xf32>,
    return
  }
  func.func @transform_0(%arg0: i32) -> i32 {
    %c0_i32 = arith.constant 0 : i32
    %c0_i32_0 = arith.constant 0 : i32
    return %c0_i32 : i32
  }
  func.func @transform_1(%arg0: i32) -> (i32, i32, i32) {
    %c0_i32 = arith.constant 0 : i32
    %c0_i32_0 = arith.constant 0 : i32
    %c0_i32_1 = arith.constant 0 : i32
    return %c0_i32, %c0_i32_0, %arg0 : i32, i32, i32
  }
  func.func @transform_2(%arg0: i32) -> (i32, i32, i32) {
    %c0_i32 = arith.constant 0 : i32
    %c0_i32_0 = arith.constant 0 : i32
    %c0_i32_1 = arith.constant 0 : i32
    return %c0_i32, %c0_i32_0, %arg0 : i32, i32, i32
  }
  func.func @transform_3(%arg0: i32) -> (i32, i32, i32) {
    %c0_i32 = arith.constant 0 : i32
    %c0_i32_0 = arith.constant 0 : i32
    %c0_i32_1 = arith.constant 0 : i32
    return %c0_i32, %c0_i32_0, %arg0 : i32, i32, i32
  }
}

</mosaic_0001>

<bundles_post_ra>
// kernel: tpu_custom_call.1
= control target key start
LH: loop header
LB: loop body
LE: loop exit
PB: predicated region body
PF: predicated region fallthrough
CT: control target
= control target key end

     0   :  { %8 = vsyncpa [#allocation4], 0  ;;  %s729_s15 = smov [#allocation3]   ;;  %s1439_s0 = inlined_call_operand.vmem [shape: f32[18], index: 0, kind: input, shape index: {}]   ;;  %s1440_s1 = inlined_call_operand.vmem [shape: f32[4,10,8], index: 1, kind: input, shape index: {}]   ;;  %s1441_s2 = inlined_call_operand.vmem [shape: f32[4,10,8], index: 2, kind: input, shape index: {}]   ;;  %s1442_s3 = inlined_call_operand.vmem [shape: f32[4,10,8], index: 3, kind: output, shape index: {}]  }
   0x1   :  { %s14_s14 = sshll.u32 %s1439_s0, 4  ;;  %s15_s14 = int_to_ptr.vmem [resolvable:$true] %s14_s14 }
   0x2   :  { %17 = dma.vmem_to_smem %s15_s14, 16, %s729_s15, [#allocation4]  }
   0x3   :  { %727 = dma.done.wait [#allocation4], 16  }
   0x4   :  { %728 = vsyncadd [#allocation4], 4294967280 }
   0x5   :  { %26 = sfence }
   0x6   :  { %vm45_vm0 = vcmask 64512   ;;  %v730_v0 = vmov 0.0   ;;  %vm47_vm1 = vcmask 58368   ;;  %s27_s0 = sld [smem:[#allocation3]]  ;;  %v124_v2 = vld [vmem:[%s1440_s1] sm:$0xff]  ;;  %vm134_vm2 = vcmask 57344  }
   0x7   :  { %46 = vst.msk [vmem:[#allocation2] sm:$0xff] %vm45_vm0, %v730_v0  ;;  %s696_s16 = sld [smem:[#allocation3 + $0x1]]  ;;  %v125_v6 = vld [vmem:[%s1440_s1 + $0x8] sm:$0x1]  ;;  %v126_v7 = vld [vmem:[%s1440_s1 + $0x10] sm:$0xff]  ;;  %v128_v13 = vld [vmem:[%s1440_s1 + $0x20] sm:$0xff] }
   0x8   :  { %49 = vst.msk [vmem:[#allocation2 + $0x10] sm:$0xff] %vm45_vm0, %v730_v0  ;;  %s876_s17 = sld [smem:[#allocation3 + $0x2]]  ;;  %v127_v8 = vld [vmem:[%s1440_s1 + $0x18] sm:$0x1]  ;;  %v129_v16 = vld [vmem:[%s1440_s1 + $0x28] sm:$0x1] }
   0x9   :  { %51 = vst.msk [vmem:[#allocation2 + $0x20] sm:$0xff] %vm45_vm0, %v730_v0  ;;  %s882_s18 = sld [smem:[#allocation3 + $0x3]]  ;;  %v143_v20 = vld [vmem:[%s1440_s1 + $0x8] sm:$0x3]  ;;  %v145_v23 = vld [vmem:[%s1440_s1 + $0x18] sm:$0x3] }
   0xa   :  { %53 = vst.msk [vmem:[#allocation2 + $0x30] sm:$0xff] %vm45_vm0, %v730_v0  ;;  %s886_s19 = sld [smem:[#allocation3 + $0x4]]  ;;  %v147_v27 = vld [vmem:[%s1440_s1 + $0x28] sm:$0x3]  ;;  %v162_v34 = vld [vmem:[%s1440_s1 + $0x19] sm:$0x1] }
   0xb   :  { %55 = vst.msk [vmem:[#allocation2 + $0x40] sm:$0xff] %vm45_vm0, %v730_v0  ;;  %s890_s20 = sld [smem:[#allocation3 + $0x5]]  ;;  %v160_v28 = vld [vmem:[%s1440_s1 + $0x9] sm:$0x1]  ;;  %v159_v47 = vld [vmem:[%s1440_s1 + $0x1] sm:$0xff]  ;;  %v161_v53 = vld [vmem:[%s1440_s1 + $0x11] sm:$0xff] }
   0xc   :  { %57 = vst.msk [vmem:[#allocation2 + $0x50] sm:$0xff] %vm45_vm0, %v730_v0  ;;  %s894_s21 = sld [smem:[#allocation3 + $0x6]]  ;;  %v915_v3 = vstv %s27_s0  ;;  %v164_v39 = vld [vmem:[%s1440_s1 + $0x29] sm:$0x1]  ;;  %v163_v54 = vld [vmem:[%s1440_s1 + $0x21] sm:$0xff] }
   0xd   :  { %60 = vst.msk [vmem:[#allocation2 + $0x60] sm:$0xff] %vm45_vm0, %v730_v0  ;;  %s898_s22 = sld [smem:[#allocation3 + $0x7]]  ;;  %v919_v5 = vstv %s696_s16 }
   0xe   :  { %62 = vst.msk [vmem:[#allocation2 + $0x70] sm:$0xff] %vm45_vm0, %v730_v0  ;;  %s902_s23 = sld [smem:[#allocation3 + $0x8]]  ;;  %v227_v1 = vld [vmem:[#allocation2] sm:$0xff]  ;;  %v942_v15 = vstv %s876_s17 }
   0xf   :  { %64 = vst.msk [vmem:[#allocation2 + $0x80] sm:$0xff] %vm45_vm0, %v730_v0  ;;  %s906_s24 = sld [smem:[#allocation3 + $0x9]]  ;;  %v236_v11 = vmul.f32 %v915_v3, %v227_v1  ;;  %v981_v29 = vstv %s882_s18 }
  0x10   :  { %66 = vst.msk [vmem:[#allocation2 + $0x90] sm:$0xff] %vm45_vm0, %v730_v0  ;;  %s913_s27 = sld [smem:[#allocation3 + $0xa]]  ;;  %v991_v35 = vstv %s886_s19 }
  0x11   :  { %68 = vst.msk [vmem:[#allocation2 + $0xa0] sm:$0xff] %vm45_vm0, %v730_v0  ;;  %s939_s9 = sld [smem:[#allocation3 + $0xb]]  ;;  %v994_v36 = vstv %s890_s20 }
  0x12   :  { %70 = vst.msk [vmem:[#allocation2 + $0xb0] sm:$0xff] %vm45_vm0, %v730_v0  ;;  %s948_s12 = sld [smem:[#allocation3 + $0xc]]  ;;  %v997_v37 = vstv %s894_s21 }
  0x13   :  { %73 = vst.msk [vmem:[#allocation2 + $0xc0] sm:$0xff] %vm45_vm0, %v730_v0  ;;  %s953_s13 = sld [smem:[#allocation3 + $0xd]]  ;;  %v1005_v41 = vstv %s898_s22 }
  0x14   :  { %75 = vst.msk [vmem:[#allocation2 + $0xd0] sm:$0xff] %vm45_vm0, %v730_v0  ;;  %v252_v4 = vld [vmem:[#allocation2 + $0x60] sm:$0xff]  ;;  %s961_s0 = sld [smem:[#allocation3 + $0xe]]  ;;  %v1008_v42 = vstv %s902_s23 }
  0x15   :  { %77 = vst.msk [vmem:[#allocation2 + $0xe0] sm:$0xff] %vm45_vm0, %v730_v0  ;;  %v261_v12 = vmul.f32 %v919_v5, %v252_v4  ;;  %s967_s25 = sld [smem:[#allocation3 + $0xf]]  ;;  %v1021_v49 = vstv %s906_s24  ;;  %v130_v4 = vld [vmem:[%s1440_s1 + $0x30] sm:$0xff] }
  0x16   :  { %79 = vst.msk [vmem:[#allocation2 + $0xf0] sm:$0xff] %vm45_vm0, %v730_v0  ;;  %s971_s26 = sld [smem:[#allocation3 + $0x10]]  ;;  %v1045_v62 = vstv %s913_s27 }
  0x17   :  { %81 = vst.msk [vmem:[#allocation2 + $0x100] sm:$0xff] %vm45_vm0, %v730_v0  ;;  %v269_v22 = vadd.f32 %v261_v12, %v236_v11  ;;  %s988_s7 = sld [smem:[#allocation3 + $0x11]]  ;;  %v149_v11 = vld [vmem:[%s1440_s1 + $0x38] sm:$0x3] }
  0x18   :  { %83 = vst.msk [vmem:[#allocation2 + $0x110] sm:$0xff] %vm45_vm0, %v730_v0  ;;  %v1048_v63 = vstv %s948_s12 }
  0x19   :  { %86 = vst.msk [vmem:[#allocation2 + $0x120] sm:$0xff] %vm45_vm0, %v730_v0 }
  0x1a   :  { %88 = vst.msk [vmem:[#allocation2 + $0x130] sm:$0xff] %vm45_vm0, %v730_v0  ;;  %v277_v14 = vld [vmem:[#allocation2 + $0xc0] sm:$0xff] }
  0x1b   :  { %90 = vst.msk [vmem:[#allocation2 + $0x140] sm:$0xff] %vm45_vm0, %v730_v0  ;;  %v286_v21 = vmul.f32 %v942_v15, %v277_v14 }
  0x1c   :  { %92 = vst.msk [vmem:[#allocation2 + $0x150] sm:$0xff] %vm45_vm0, %v730_v0 }
  0x1d   :  { %94 = vst.msk [vmem:[#allocation2 + $0x160] sm:$0xff] %vm45_vm0, %v730_v0  ;;  %v294_v32 = vadd.f32 %v286_v21, %v269_v22 }
  0x1e   :  { %96 = vst.msk [vmem:[#allocation2 + $0x170] sm:$0xff] %vm45_vm0, %v730_v0 }
  0x1f   :  { %99 = vst.msk [vmem:[#allocation2 + $0x180] sm:$0xff] %vm45_vm0, %v730_v0 }
  0x20   :  { %101 = vst.msk [vmem:[#allocation2 + $0x190] sm:$0xff] %vm45_vm0, %v730_v0  ;;  %v455_v48 = vld [vmem:[#allocation2 + $0x120] sm:$0xff] }
  0x21   :  { %103 = vst.msk [vmem:[#allocation2 + $0x1a0] sm:$0xff] %vm45_vm0, %v730_v0 }
  0x22   :  { %105 = vst.msk [vmem:[#allocation2 + $0x1b0] sm:$0xff] %vm45_vm0, %v730_v0 }
  0x23   :  { %107 = vst.msk [vmem:[#allocation2 + $0x1c0] sm:$0xff] %vm45_vm0, %v730_v0 }
  0x24   :  { %109 = vst.msk [vmem:[#allocation2 + $0x1d0] sm:$0xff] %vm45_vm0, %v730_v0 }
  0x25   :  { %112 = vst.msk [vmem:[#allocation2 + $0x1e0] sm:$0xff] %vm45_vm0, %v730_v0 }
  0x26   :  { %114 = vst.msk [vmem:[#allocation2 + $0x1f0] sm:$0xff] %vm45_vm0, %v730_v0  ;;  %v480_v61 = vld [vmem:[#allocation2 + $0x180] sm:$0xff] }
  0x27   :  { %116 = vst.msk [vmem:[#allocation2 + $0x200] sm:$0xff] %vm45_vm0, %v730_v0  ;;  %v1090_v22 = vmul.f32 %v1045_v62, %v480_v61 }
  0x28   :  { %118 = vst.msk [vmem:[#allocation2 + $0x210] sm:$0xff] %vm45_vm0, %v730_v0 }
  0x29   :  { %120 = vst.msk [vmem:[#allocation2 + $0x220] sm:$0xff] %vm45_vm0, %v730_v0 }
  0x2a   :  { %122 = vst.msk [vmem:[#allocation2 + $0x230] sm:$0xff] %vm45_vm0, %v730_v0 }
  0x2b   :  { %48 = vst.msk [vmem:[#allocation2 + $0x8] sm:$0x3] %vm47_vm1, %v730_v0 }
  0x2c   :  { %50 = vst.msk [vmem:[#allocation2 + $0x18] sm:$0x3] %vm47_vm1, %v730_v0  ;;  %v505_v12 = vld [vmem:[#allocation2 + $0x1e0] sm:$0xff] }
  0x2d   :  { %52 = vst.msk [vmem:[#allocation2 + $0x28] sm:$0x3] %vm47_vm1, %v730_v0 }
  0x2e   :  { %54 = vst.msk [vmem:[#allocation2 + $0x38] sm:$0x3] %vm47_vm1, %v730_v0 }
  0x2f   :  { %56 = vst.msk [vmem:[#allocation2 + $0x48] sm:$0x3] %vm47_vm1, %v730_v0 }
  0x30   :  { %58 = vst.msk [vmem:[#allocation2 + $0x58] sm:$0x3] %vm47_vm1, %v730_v0 }
  0x31   :  { %61 = vst.msk [vmem:[#allocation2 + $0x68] sm:$0x3] %vm47_vm1, %v730_v0 }
  0x32   :  { %63 = vst.msk [vmem:[#allocation2 + $0x78] sm:$0x3] %vm47_vm1, %v730_v0  ;;  %v228_v9 = vld [vmem:[#allocation2 + $0x8] sm:$0x3] }
  0x33   :  { %65 = vst.msk [vmem:[#allocation2 + $0x88] sm:$0x3] %vm47_vm1, %v730_v0  ;;  %v237_v17 = vmul.f32 %v915_v3, %v228_v9 }
  0x34   :  { %67 = vst.msk [vmem:[#allocation2 + $0x98] sm:$0x3] %vm47_vm1, %v730_v0 }
  0x35   :  { %69 = vst.msk [vmem:[#allocation2 + $0xa8] sm:$0x3] %vm47_vm1, %v730_v0 }
  0x36   :  { %71 = vst.msk [vmem:[#allocation2 + $0xb8] sm:$0x3] %vm47_vm1, %v730_v0 }
  0x37   :  { %74 = vst.msk [vmem:[#allocation2 + $0xc8] sm:$0x3] %vm47_vm1, %v730_v0 }
  0x38   :  { %76 = vst.msk [vmem:[#allocation2 + $0xd8] sm:$0x3] %vm47_vm1, %v730_v0  ;;  %v253_v10 = vld [vmem:[#allocation2 + $0x68] sm:$0x3] }
  0x39   :  { %78 = vst.msk [vmem:[#allocation2 + $0xe8] sm:$0x3] %vm47_vm1, %v730_v0  ;;  %v262_v18 = vmul.f32 %v919_v5, %v253_v10 }
  0x3a   :  { %80 = vst.msk [vmem:[#allocation2 + $0xf8] sm:$0x3] %vm47_vm1, %v730_v0 }
  0x3b   :  { %82 = vst.msk [vmem:[#allocation2 + $0x108] sm:$0x3] %vm47_vm1, %v730_v0  ;;  %v270_v25 = vadd.f32 %v262_v18, %v237_v17 }
  0x3c   :  { %84 = vst.msk [vmem:[#allocation2 + $0x118] sm:$0x3] %vm47_vm1, %v730_v0 }
  0x3d   :  { %87 = vst.msk [vmem:[#allocation2 + $0x128] sm:$0x3] %vm47_vm1, %v730_v0 }
  0x3e   :  { %89 = vst.msk [vmem:[#allocation2 + $0x138] sm:$0x3] %vm47_vm1, %v730_v0  ;;  %v278_v19 = vld [vmem:[#allocation2 + $0xc8] sm:$0x3] }
  0x3f   :  { %91 = vst.msk [vmem:[#allocation2 + $0x148] sm:$0x3] %vm47_vm1, %v730_v0  ;;  %v287_v24 = vmul.f32 %v942_v15, %v278_v19 }
  0x40   :  { %93 = vst.msk [vmem:[#allocation2 + $0x158] sm:$0x3] %vm47_vm1, %v730_v0 }
  0x41   :  { %95 = vst.msk [vmem:[#allocation2 + $0x168] sm:$0x3] %vm47_vm1, %v730_v0  ;;  %v295_v43 = vadd.f32 %v287_v24, %v270_v25 }
  0x42   :  { %97 = vst.msk [vmem:[#allocation2 + $0x178] sm:$0x3] %vm47_vm1, %v730_v0 }
  0x43   :  { %100 = vst.msk [vmem:[#allocation2 + $0x188] sm:$0x3] %vm47_vm1, %v730_v0 }
  0x44   :  { %102 = vst.msk [vmem:[#allocation2 + $0x198] sm:$0x3] %vm47_vm1, %v730_v0 }
  0x45   :  { %104 = vst.msk [vmem:[#allocation2 + $0x1a8] sm:$0x3] %vm47_vm1, %v730_v0 }
  0x46   :  { %106 = vst.msk [vmem:[#allocation2 + $0x1b8] sm:$0x3] %vm47_vm1, %v730_v0 }
  0x47   :  { %108 = vst.msk [vmem:[#allocation2 + $0x1c8] sm:$0x3] %vm47_vm1, %v730_v0 }
  0x48   :  { %110 = vst.msk [vmem:[#allocation2 + $0x1d8] sm:$0x3] %vm47_vm1, %v730_v0 }
  0x49   :  { %113 = vst.msk [vmem:[#allocation2 + $0x1e8] sm:$0x3] %vm47_vm1, %v730_v0 }
  0x4a   :  { %115 = vst.msk [vmem:[#allocation2 + $0x1f8] sm:$0x3] %vm47_vm1, %v730_v0 }
  0x4b   :  { %117 = vst.msk [vmem:[#allocation2 + $0x208] sm:$0x3] %vm47_vm1, %v730_v0 }
  0x4c   :  { %119 = vst.msk [vmem:[#allocation2 + $0x218] sm:$0x3] %vm47_vm1, %v730_v0 }
  0x4d   :  { %121 = vst.msk [vmem:[#allocation2 + $0x228] sm:$0x3] %vm47_vm1, %v730_v0 }
  0x4e   :  { %1444 = vst [vmem:[#allocation6_spill] sm:$0xff] %v919_v5 }
  0x4f   :  { %123 = vst.msk [vmem:[#allocation2 + $0x238] sm:$0x3] %vm47_vm1, %v730_v0  ;;  %v1051_v0 = vstv %s967_s25 }
  0x50   :  { %133 = vst.msk [vmem:[#allocation2 + $0x11] sm:$0xff] %vm45_vm0, %v124_v2 }
  0x51   :  { %135 = vst.msk [vmem:[#allocation2 + $0x19] sm:$0x1] %vm134_vm2, %v125_v6  ;;  %v131_v6 = vld [vmem:[%s1440_s1 + $0x38] sm:$0x1] }
  0x52   :  { %136 = vst.msk [vmem:[#allocation2 + $0x21] sm:$0xff] %vm45_vm0, %v126_v7 }
  0x53   :  { %137 = vst.msk [vmem:[#allocation2 + $0x29] sm:$0x1] %vm134_vm2, %v127_v8 }
  0x54   :  { %138 = vst.msk [vmem:[#allocation2 + $0x31] sm:$0xff] %vm45_vm0, %v128_v13 }
  0x55   :  { %139 = vst.msk [vmem:[#allocation2 + $0x39] sm:$0x1] %vm134_vm2, %v129_v16 }
  0x56   :  { %151 = vst.msk [vmem:[#allocation2 + $0x70] sm:$0xff] %vm45_vm0, %v124_v2 }
  0x57   :  { %152 = vst.msk [vmem:[#allocation2 + $0x78] sm:$0x3] %vm47_vm1, %v143_v20  ;;  %v229_v26 = vld [vmem:[#allocation2 + $0x10] sm:$0xff]  ;;  %v166_v20 = vld [vmem:[%s1440_s1 + $0x39] sm:$0x1] }
  0x58   :  { %153 = vst.msk [vmem:[#allocation2 + $0x80] sm:$0xff] %vm45_vm0, %v126_v7  ;;  %v230_v30 = vld [vmem:[#allocation2 + $0x18] sm:$0x3]  ;;  %v311_v40 = vmul.f32 %v981_v29, %v229_v26  ;;  %v1011_v44 = vmul.f32 %v915_v3, %v229_v26  ;;  %v1064_v7 = vmul.f32 %v1021_v49, %v455_v48  ;;  %v1096_v26 = vstv %s953_s13 }
  0x59   :  { %v303_v31 = vld [vmem:[#allocation2 + $0x18] sm:$0x3]  ;;  %154 = vst.msk [vmem:[#allocation2 + $0x88] sm:$0x3] %vm47_vm1, %v145_v23  ;;  %v231_v33 = vld [vmem:[#allocation2 + $0x20] sm:$0xff]  ;;  %v1014_v45 = vmul.f32 %v915_v3, %v230_v30 }
  0x5a   :  { %155 = vst.msk [vmem:[#allocation2 + $0x90] sm:$0xff] %vm45_vm0, %v128_v13  ;;  %v232_v38 = vld [vmem:[#allocation2 + $0x28] sm:$0x3]  ;;  %v312_v50 = vmul.f32 %v981_v29, %v303_v31  ;;  %v1025_v51 = vmul.f32 %v915_v3, %v231_v33  ;;  %v319_v55 = vadd.f32 %v311_v40, %v294_v32  ;;  %v1035_v56 = vmul.f32 %v997_v37, %v231_v33 }
  0x5b   :  { %156 = vst.msk [vmem:[#allocation2 + $0x98] sm:$0x3] %vm47_vm1, %v147_v27  ;;  %v233_v46 = vld [vmem:[#allocation2 + $0x30] sm:$0xff]  ;;  %v305_v52 = vld [vmem:[#allocation2 + $0x28] sm:$0x3]  ;;  %v1038_v57 = vmul.f32 %v981_v29, %v231_v33  ;;  %v1041_v58 = vmul.f32 %v915_v3, %v232_v38  ;;  %v1075_v13 = vstv %s939_s9  ;;  %v1099_v27 = vstv %s961_s0 }
  0x5c   :  { %169 = vst.msk [vmem:[#allocation2 + $0xd8] sm:$0x1] %vm134_vm2, %v160_v28  ;;  %v1054_v1 = vmul.f32 %v915_v3, %v233_v46  ;;  %v320_v8 = vadd.f32 %v312_v50, %v295_v43  ;;  %v1067_v9 = vmul.f32 %v997_v37, %v233_v46  ;;  %v1078_v16 = vmul.f32 %v981_v29, %v305_v52  ;;  %v379_v30 = vld [vmem:[#allocation2 + $0x28] sm:$0x3] }
  0x5d   :  { %171 = vst.msk [vmem:[#allocation2 + $0xe8] sm:$0x1] %vm134_vm2, %v162_v34  ;;  %v254_v59 = vld [vmem:[#allocation2 + $0x70] sm:$0xff]  ;;  %v1081_v17 = vmul.f32 %v981_v29, %v233_v46  ;;  %v1102_v28 = vstv %s971_s26  ;;  %v1109_v38 = vmul.f32 %v1075_v13, %v505_v12  ;;  %v456_v50 = vld [vmem:[#allocation2 + $0x128] sm:$0x3]  ;;  %v388_v61 = vmul.f32 %v997_v37, %v379_v30 }
  0x5e   :  { %v255_v60 = vld [vmem:[#allocation2 + $0x78] sm:$0x3]  ;;  %173 = vst.msk [vmem:[#allocation2 + $0xf8] sm:$0x1] %vm134_vm2, %v164_v39  ;;  %v263_v18 = vmul.f32 %v919_v5, %v254_v59  ;;  %v336_v21 = vmul.f32 %v991_v35, %v254_v59  ;;  %v1129_v59 = vld [vmem:[%s1441_s2 + $0x10] sm:$0xff] }
  0x5f   :  { %v256_v2 = vld [vmem:[#allocation2 + $0x80] sm:$0xff]  ;;  %168 = vst.msk [vmem:[#allocation2 + $0xd0] sm:$0xff] %vm45_vm0, %v159_v47  ;;  %v264_v10 = vmul.f32 %v919_v5, %v255_v60  ;;  %v328_v14 = vld [vmem:[#allocation2 + $0x78] sm:$0x3]  ;;  %v1132_v60 = vstv %s988_s7 }
  0x60   :  { %170 = vst.msk [vmem:[#allocation2 + $0xe0] sm:$0xff] %vm45_vm0, %v161_v53  ;;  %v257_v19 = vld [vmem:[#allocation2 + $0x88] sm:$0x3]  ;;  %v337_v23 = vmul.f32 %v991_v35, %v328_v14  ;;  %v265_v24 = vmul.f32 %v919_v5, %v256_v2  ;;  %v344_v33 = vadd.f32 %v336_v21, %v319_v55  ;;  %v1106_v34 = vmul.f32 %v1005_v41, %v256_v2  ;;  %v165_v47 = vld [vmem:[%s1440_s1 + $0x31] sm:$0xff]  ;;  %v176_v55 = vld [vmem:[%s1441_s2] sm:$0xff] }
  0x61   :  { %172 = vst.msk [vmem:[#allocation2 + $0xf0] sm:$0xff] %vm45_vm0, %v163_v54  ;;  %v258_v25 = vld [vmem:[#allocation2 + $0x90] sm:$0xff]  ;;  %v405_v31 = vld [vmem:[#allocation2 + $0x88] sm:$0x3]  ;;  %v266_v43 = vmul.f32 %v919_v5, %v257_v19  ;;  %v272_v52 = vadd.f32 %v264_v10, %v1014_v45  ;;  %v271_v45 = vadd.f32 %v263_v18, %v1011_v44  ;;  %v338_v12 = vmul.f32 %v991_v35, %v256_v2 }
  0x62   :  { %140 = vst.msk [vmem:[#allocation2 + $0x41] sm:$0xff] %vm45_vm0, %v130_v4  ;;  %v345_v39 = vadd.f32 %v337_v23, %v320_v8  ;;  %v1120_v53 = vmul.f32 %v919_v5, %v258_v25  ;;  %v414_v10 = vmul.f32 %v1005_v41, %v405_v31  ;;  %v177_v44 = vld [vmem:[%s1441_s2 + $0x8] sm:$0x1]  ;;  %v1152_v23 = vmul.f32 %v1005_v41, %v258_v25 }
  0x63   :  { %v280_v32 = vld [vmem:[#allocation2 + $0xd8] sm:$0x3]  ;;  %141 = vst.msk [vmem:[#allocation2 + $0x49] sm:$0x1] %vm134_vm2, %v131_v6  ;;  %v1140_v6 = vld [vmem:[%s1441_s2 + $0x20] sm:$0xff] }
  0x64   :  { %v353_v40 = vld [vmem:[#allocation2 + $0xd8] sm:$0x3]  ;;  %v289_v46 = vmul.f32 %v942_v15, %v280_v32  ;;  %157 = vst.msk [vmem:[#allocation2 + $0xa0] sm:$0xff] %vm45_vm0, %v130_v4  ;;  %v282_v54 = vld [vmem:[#allocation2 + $0xe8] sm:$0x3] }
  0x65   :  { %v362_v48 = vmul.f32 %v994_v36, %v353_v40  ;;  %158 = vst.msk [vmem:[#allocation2 + $0xa8] sm:$0x3] %vm47_vm1, %v149_v11  ;;  %v431_v11 = vld [vmem:[#allocation2 + $0xe8] sm:$0x3]  ;;  %v291_v2 = vmul.f32 %v942_v15, %v282_v54 }
  0x66   :  { %v279_v4 = vld [vmem:[#allocation2 + $0xd0] sm:$0xff]  ;;  %175 = vst.msk [vmem:[#allocation2 + $0x108] sm:$0x1] %vm134_vm2, %v166_v20  ;;  %v297_v14 = vadd.f32 %v289_v46, %v272_v52  ;;  %v465_v20 = vmul.f32 %v1021_v49, %v456_v50  ;;  %v330_v30 = vld [vmem:[#allocation2 + $0x88] sm:$0x3]  ;;  %v273_v46 = vadd.f32 %v265_v24, %v1025_v51  ;;  %v440_v50 = vmul.f32 %v1008_v42, %v431_v11 }
  0x67   :  { %v370_v8 = vadd.f32 %v362_v48, %v345_v39  ;;  %v288_v19 = vmul.f32 %v942_v15, %v279_v4  ;;  %v281_v21 = vld [vmem:[#allocation2 + $0xe0] sm:$0xff]  ;;  %174 = vst.msk [vmem:[#allocation2 + $0x100] sm:$0xff] %vm45_vm0, %v165_v47  ;;  %v361_v18 = vmul.f32 %v994_v36, %v279_v4  ;;  %v481_v39 = vld [vmem:[#allocation2 + $0x188] sm:$0x3]  ;;  %v179_v47 = vld [vmem:[%s1441_s2 + $0x18] sm:$0x1]  ;;  %v340_v4 = vmul.f32 %v991_v35, %v258_v25 }
  0x68   :  { %v290_v31 = vmul.f32 %v942_v15, %v281_v21  ;;  %185 = vst.msk [vmem:[#allocation2 + $0x131] sm:$0xff] %vm45_vm0, %v176_v55  ;;  %v506_v40 = vld [vmem:[#allocation2 + $0x1e8] sm:$0x3]  ;;  %v490_v25 = vmul.f32 %v1045_v62, %v481_v39  ;;  %v283_v5 = vld [vmem:[#allocation2 + $0xf0] sm:$0xff]  ;;  %v196_v39 = vld [vmem:[%s1441_s2 + $0x18] sm:$0x3] }
  0x69   :  { %v396_v32 = vadd.f32 %v388_v61, %v370_v8  ;;  %187 = vst.msk [vmem:[#allocation2 + $0x141] sm:$0xff] %vm45_vm0, %v1129_v59  ;;  %v369_v48 = vadd.f32 %v361_v18, %v344_v33  ;;  %v296_v52 = vadd.f32 %v288_v19, %v271_v45  ;;  %v355_v54 = vld [vmem:[#allocation2 + $0xe8] sm:$0x3]  ;;  %v322_v61 = vadd.f32 %v1078_v16, %v297_v14  ;;  %v381_v18 = vld [vmem:[#allocation2 + $0x38] sm:$0x3] }
  0x6a   :  { %189 = vst.msk [vmem:[#allocation2 + $0x151] sm:$0xff] %vm45_vm0, %v1140_v6  ;;  %v181_v51 = vld [vmem:[%s1441_s2 + $0x28] sm:$0x1]  ;;  %v339_v8 = vmul.f32 %v991_v35, %v330_v30  ;;  %v274_v33 = vadd.f32 %v266_v43, %v1041_v58  ;;  %v515_v11 = vmul.f32 %v1075_v13, %v506_v40  ;;  %v364_v43 = vmul.f32 %v994_v36, %v355_v54 }
  0x6b   :  { %v422_v24 = vadd.f32 %v414_v10, %v396_v32  ;;  %186 = vst.msk [vmem:[#allocation2 + $0x139] sm:$0x1] %vm134_vm2, %v177_v44  ;;  %v395_v45 = vadd.f32 %v1035_v56, %v369_v48  ;;  %v321_v19 = vadd.f32 %v1038_v57, %v296_v52  ;;  %v194_v16 = vld [vmem:[%s1441_s2 + $0x8] sm:$0x3]  ;;  %v298_v14 = vadd.f32 %v290_v31, %v273_v46  ;;  %v407_v32 = vld [vmem:[#allocation2 + $0x98] sm:$0x3] }
  0x6c   :  { %188 = vst.msk [vmem:[#allocation2 + $0x149] sm:$0x1] %vm134_vm2, %v179_v47  ;;  %v347_v58 = vadd.f32 %v339_v8, %v322_v61  ;;  %v439_v44 = vmul.f32 %v1008_v42, %v281_v21  ;;  %v363_v30 = vmul.f32 %v994_v36, %v281_v21  ;;  %v390_v31 = vmul.f32 %v997_v37, %v381_v18  ;;  %v433_v46 = vld [vmem:[#allocation2 + $0xf8] sm:$0x3]  ;;  %v1214_v8 = vld [vmem:[#allocation2 + $0xa0] sm:$0xff] }
  0x6d   :  { %v448_v10 = vadd.f32 %v440_v50, %v422_v24  ;;  %190 = vst.msk [vmem:[#allocation2 + $0x159] sm:$0x1] %vm134_vm2, %v181_v51  ;;  %v421_v56 = vadd.f32 %v1106_v34, %v395_v45  ;;  %v346_v57 = vadd.f32 %v338_v12, %v321_v19  ;;  %v323_v48 = vadd.f32 %v1081_v17, %v298_v14  ;;  %v1196_v12 = vld [vmem:[#allocation2 + $0x40] sm:$0xff]  ;;  %v211_v17 = vld [vmem:[%s1441_s2 + $0x9] sm:$0x1] }
  0x6e   :  { %202 = vst.msk [vmem:[#allocation2 + $0x190] sm:$0xff] %vm45_vm0, %v176_v55  ;;  %v372_v47 = vadd.f32 %v364_v43, %v347_v58  ;;  %v1194_v34 = vmul.f32 %v942_v15, %v283_v5  ;;  %v198_v55 = vld [vmem:[%s1441_s2 + $0x28] sm:$0x3]  ;;  %v213_v52 = vld [vmem:[%s1441_s2 + $0x19] sm:$0x1]  ;;  %v441_v51 = vmul.f32 %v1008_v42, %v283_v5  ;;  %v416_v61 = vmul.f32 %v1005_v41, %v407_v32  ;;  %v1221_v18 = vld [vmem:[#allocation2 + $0x100] sm:$0xff] }
  0x6f   :  { %v473_v40 = vadd.f32 %v465_v20, %v448_v10  ;;  %203 = vst.msk [vmem:[#allocation2 + $0x198] sm:$0x3] %vm47_vm1, %v194_v16  ;;  %v447_v21 = vadd.f32 %v439_v44, %v421_v56  ;;  %v371_v50 = vadd.f32 %v363_v30, %v346_v57  ;;  %v1202_v20 = vadd.f32 %v291_v2, %v274_v33  ;;  %v307_v2 = vld [vmem:[#allocation2 + $0x38] sm:$0x3] }
  0x70   :  { %204 = vst.msk [vmem:[#allocation2 + $0x1a0] sm:$0xff] %vm45_vm0, %v1129_v59  ;;  %v398_v24 = vadd.f32 %v390_v31, %v372_v47  ;;  %v442_v45 = vmul.f32 %v1008_v42, %v433_v46  ;;  %v365_v19 = vmul.f32 %v994_v36, %v283_v5  ;;  %v348_v14 = vadd.f32 %v340_v4, %v323_v48  ;;  %v215_v5 = vld [vmem:[%s1441_s2 + $0x29] sm:$0x1]  ;;  %v606_v57 = vld [vmem:[#allocation2 + $0x140] sm:$0xff] }
  0x71   :  { %v498_v54 = vadd.f32 %v490_v25, %v473_v40  ;;  %205 = vst.msk [vmem:[#allocation2 + $0x1a8] sm:$0x3] %vm47_vm1, %v196_v39  ;;  %v472_v59 = vadd.f32 %v1064_v7, %v447_v21  ;;  %v397_v33 = vadd.f32 %v1067_v9, %v371_v50  ;;  %v530_v25 = vld [vmem:[#allocation2 + $0x130] sm:$0xff]  ;;  %v391_v7 = vmul.f32 %v997_v37, %v1196_v12  ;;  %v210_v9 = vld [vmem:[%s1441_s2 + $0x1] sm:$0xff] }
  0x72   :  { %206 = vst.msk [vmem:[#allocation2 + $0x1b0] sm:$0xff] %vm45_vm0, %v1140_v6  ;;  %v531_v10 = vld [vmem:[#allocation2 + $0x138] sm:$0x3]  ;;  %v424_v58 = vadd.f32 %v416_v61, %v398_v24  ;;  %v417_v44 = vmul.f32 %v1005_v41, %v1214_v8  ;;  %v1244_v39 = vld [vmem:[#allocation2 + $0x150] sm:$0xff]  ;;  %v373_v47 = vadd.f32 %v365_v19, %v348_v14  ;;  %v316_v50 = vmul.f32 %v981_v29, %v307_v2 }
  0x73   :  { %v523_v16 = vadd.f32 %v515_v11, %v498_v54  ;;  %v458_v43 = vld [vmem:[#allocation2 + $0x138] sm:$0x3]  ;;  %207 = vst.msk [vmem:[#allocation2 + $0x1b8] sm:$0x3] %vm47_vm1, %v198_v55  ;;  %v497_v11 = vadd.f32 %v1090_v22, %v472_v59  ;;  %v423_v4 = vadd.f32 %v1152_v23, %v397_v33  ;;  %v540_v30 = vmul.f32 %v1048_v63, %v531_v10  ;;  %v607_v32 = vld [vmem:[#allocation2 + $0x148] sm:$0x3] }
  0x74   :  { %v212_v6 = vld [vmem:[%s1441_s2 + $0x11] sm:$0xff]  ;;  %v467_v56 = vmul.f32 %v1021_v49, %v458_v43  ;;  %220 = vst.msk [vmem:[#allocation2 + $0x1f8] sm:$0x1] %vm134_vm2, %v211_v17  ;;  %v450_v40 = vadd.f32 %v442_v45, %v424_v58  ;;  %v443_v22 = vmul.f32 %v1008_v42, %v1221_v18  ;;  %v214_v23 = vld [vmem:[%s1441_s2 + $0x21] sm:$0xff]  ;;  %v466_v55 = vmul.f32 %v530_v25, %v1021_v49 }
  0x75   :  { %222 = vst.msk [vmem:[#allocation2 + $0x208] sm:$0x1] %vm134_vm2, %v213_v52  ;;  %v522_v31 = vadd.f32 %v1109_v38, %v497_v11  ;;  %v555_v46 = vld [vmem:[#allocation2 + $0x190] sm:$0xff]  ;;  %v449_v48 = vadd.f32 %v441_v51, %v423_v4  ;;  %v533_v21 = vld [vmem:[#allocation2 + $0x148] sm:$0x3]  ;;  %v539_v17 = vmul.f32 %v1048_v63, %v530_v25  ;;  %v548_v54 = vadd.f32 %v540_v30, %v523_v16 }
  0x76   :  { %224 = vst.msk [vmem:[#allocation2 + $0x218] sm:$0x1] %vm134_vm2, %v215_v5  ;;  %v556_v24 = vld [vmem:[#allocation2 + $0x198] sm:$0x3]  ;;  %v475_v52 = vadd.f32 %v467_v56, %v450_v40  ;;  %v399_v59 = vadd.f32 %v391_v7, %v373_v47  ;;  %v182_v38 = vld [vmem:[%s1441_s2 + $0x30] sm:$0xff]  ;;  %v1262_v51 = vmul.f32 %v1051_v0, %v606_v57  ;;  %v1265_v2 = vmul.f32 %v606_v57, %v1048_v63 }
  0x77   :  { %v483_v61 = vld [vmem:[#allocation2 + $0x198] sm:$0x3]  ;;  %219 = vst.msk [vmem:[#allocation2 + $0x1f0] sm:$0xff] %vm45_vm0, %v210_v9  ;;  %v1269_v33 = vmul.f32 %v1051_v0, %v1244_v39  ;;  %v632_v10 = vld [vmem:[#allocation2 + $0x1a0] sm:$0xff]  ;;  %v565_v58 = vmul.f32 %v1096_v26, %v556_v24  ;;  %v616_v43 = vmul.f32 %v1051_v0, %v607_v32  ;;  %v468_v7 = vmul.f32 %v606_v57, %v1021_v49 }
  0x78   :  { %v492_v45 = vmul.f32 %v1045_v62, %v483_v61  ;;  %v609_v19 = vld [vmem:[#allocation2 + $0x158] sm:$0x3]  ;;  %221 = vst.msk [vmem:[#allocation2 + $0x200] sm:$0xff] %vm45_vm0, %v212_v6  ;;  %v425_v14 = vadd.f32 %v417_v44, %v399_v59  ;;  %v547_v9 = vadd.f32 %v539_v17, %v522_v31  ;;  %v474_v6 = vadd.f32 %v466_v55, %v449_v48  ;;  %v633_v32 = vld [vmem:[#allocation2 + $0x1a8] sm:$0x3] }
  0x79   :  { %v183_v25 = vld [vmem:[%s1441_s2 + $0x38] sm:$0x1]  ;;  %223 = vst.msk [vmem:[#allocation2 + $0x210] sm:$0xff] %vm45_vm0, %v214_v23  ;;  %v217_v5 = vld [vmem:[%s1441_s2 + $0x39] sm:$0x1]  ;;  %v491_v11 = vmul.f32 %v555_v46, %v1045_v62  ;;  %v542_v4 = vmul.f32 %v1048_v63, %v533_v21  ;;  %v573_v30 = vadd.f32 %v565_v58, %v548_v54  ;;  %v1290_v57 = vmul.f32 %v1051_v0, %v609_v19 }
  0x7a   :  { %v200_v16 = vld [vmem:[%s1441_s2 + $0x38] sm:$0x3]  ;;  %191 = vst.msk [vmem:[#allocation2 + $0x161] sm:$0xff] %vm45_vm0, %v182_v38  ;;  %v500_v44 = vadd.f32 %v492_v45, %v475_v52  ;;  %v558_v40 = vld [vmem:[#allocation2 + $0x1a8] sm:$0x3]  ;;  %v451_v47 = vadd.f32 %v443_v22, %v425_v14  ;;  %v564_v23 = vmul.f32 %v1096_v26, %v555_v46  ;;  %v641_v31 = vmul.f32 %v1102_v28, %v632_v10 }
  0x7b   :  { %v332_v56 = vld [vmem:[#allocation2 + $0x98] sm:$0x3]  ;;  %192 = vst.msk [vmem:[#allocation2 + $0x169] sm:$0x1] %vm134_vm2, %v183_v25  ;;  %v566_v55 = vmul.f32 %v632_v10, %v1096_v26  ;;  %v493_v17 = vmul.f32 %v632_v10, %v1045_v62  ;;  %v324_v46 = vadd.f32 %v316_v50, %v1202_v20  ;;  %v642_v59 = vmul.f32 %v1102_v28, %v633_v32  ;;  %v1306_v25 = vld [vmem:[#allocation2 + $0x1b0] sm:$0xff] }
  0x7c   :  { %v581_v48 = vld [vmem:[#allocation2 + $0x1f8] sm:$0x3]  ;;  %208 = vst.msk [vmem:[#allocation2 + $0x1c0] sm:$0xff] %vm45_vm0, %v182_v38  ;;  %v476_v52 = vadd.f32 %v468_v7, %v451_v47  ;;  %v572_v61 = vadd.f32 %v564_v23, %v547_v9  ;;  %v659_v45 = vld [vmem:[#allocation2 + $0x208] sm:$0x3]  ;;  %v499_v19 = vadd.f32 %v491_v11, %v474_v6  ;;  %v341_v38 = vmul.f32 %v991_v35, %v332_v56 }
  0x7d   :  { %v508_v21 = vld [vmem:[#allocation2 + $0x1f8] sm:$0x3]  ;;  %v590_v22 = vmul.f32 %v1099_v27, %v581_v48  ;;  %209 = vst.msk [vmem:[#allocation2 + $0x1c8] sm:$0x3] %vm47_vm1, %v200_v16  ;;  %v567_v7 = vmul.f32 %v1096_v26, %v558_v40  ;;  %v543_v20 = vmul.f32 %v1244_v39, %v1048_v63  ;;  %v583_v11 = vld [vmem:[#allocation2 + $0x208] sm:$0x3]  ;;  %v568_v40 = vmul.f32 %v1306_v25, %v1096_v26 }
  0x7e   :  { %v216_v54 = vld [vmem:[%s1441_s2 + $0x31] sm:$0xff]  ;;  %v517_v24 = vmul.f32 %v1075_v13, %v508_v21  ;;  %226 = vst.msk [vmem:[#allocation2 + $0x228] sm:$0x1] %vm134_vm2, %v217_v5  ;;  %v501_v56 = vadd.f32 %v493_v17, %v476_v52  ;;  %v349_v32 = vadd.f32 %v341_v38, %v324_v46  ;;  %v383_v5 = vld [vmem:[#allocation2 + $0x48] sm:$0x3] }
  0x7f   :  { %v580_v10 = vld [vmem:[#allocation2 + $0x1f0] sm:$0xff]  ;;  %v598_v58 = vadd.f32 %v590_v22, %v573_v30  ;;  %v357_v50 = vld [vmem:[#allocation2 + $0xf8] sm:$0x3]  ;;  %225 = vst.msk [vmem:[#allocation2 + $0x220] sm:$0xff] %vm45_vm0, %v216_v54  ;;  %v658_v9 = vld [vmem:[#allocation2 + $0x200] sm:$0xff]  ;;  %v668_v30 = vmul.f32 %v1132_v60, %v659_v45  ;;  %v392_v17 = vmul.f32 %v997_v37, %v383_v5 }
  0x80   :  { %v525_v14 = vadd.f32 %v517_v24, %v500_v44  ;;  %v589_v16 = vmul.f32 %v1099_v27, %v580_v10  ;;  %v516_v6 = vmul.f32 %v580_v10, %v1075_v13  ;;  %v518_v21 = vmul.f32 %v658_v9, %v1075_v13  ;;  %v661_v46 = vld [vmem:[#allocation2 + $0x218] sm:$0x3]  ;;  %v460_v5 = vld [vmem:[#allocation2 + $0x148] sm:$0x3] }
  0x81   :  { %v624_v47 = vadd.f32 %v616_v43, %v598_v58  ;;  %v366_v54 = vmul.f32 %v994_v36, %v357_v50  ;;  %v592_v10 = vmul.f32 %v1099_v27, %v583_v11 }
  0x82   :  { %v550_v44 = vadd.f32 %v542_v4, %v525_v14  ;;  %v597_v23 = vadd.f32 %v589_v16, %v572_v61  ;;  %v524_v48 = vadd.f32 %v516_v6, %v499_v19  ;;  %v635_v4 = vld [vmem:[#allocation2 + $0x1b8] sm:$0x3]  ;;  %v526_v45 = vadd.f32 %v518_v21, %v501_v56  ;;  %v409_v61 = vld [vmem:[#allocation2 + $0xa8] sm:$0x3] }
  0x83   :  { %v650_v22 = vadd.f32 %v642_v59, %v624_v47  ;;  %v374_v38 = vadd.f32 %v366_v54, %v349_v32  ;;  %v667_v19 = vmul.f32 %v1132_v60, %v658_v9  ;;  %v591_v14 = vmul.f32 %v658_v9, %v1099_v27  ;;  %v1327_v59 = vld [vmem:[#allocation2 + $0x210] sm:$0xff]  ;;  %v1336_v32 = vld [vmem:[#allocation2 + $0x160] sm:$0xff] }
  0x84   :  { %v575_v24 = vadd.f32 %v567_v7, %v550_v44  ;;  %v623_v43 = vadd.f32 %v1262_v51, %v597_v23  ;;  %v549_v52 = vadd.f32 %v1265_v2, %v524_v48  ;;  %v551_v6 = vadd.f32 %v543_v20, %v526_v45  ;;  %v435_v51 = vld [vmem:[#allocation2 + $0x108] sm:$0x3]  ;;  %v1341_v48 = vld [vmem:[#allocation2 + $0x1c0] sm:$0xff] }
  0x85   :  { %v676_v58 = vadd.f32 %v668_v30, %v650_v22  ;;  %v400_v11 = vadd.f32 %v392_v17, %v374_v38  ;;  %v644_v56 = vmul.f32 %v1102_v28, %v635_v4  ;;  %v670_v9 = vmul.f32 %v1132_v60, %v661_v46  ;;  %v485_v44 = vld [vmem:[#allocation2 + $0x1a8] sm:$0x3]  ;;  %v234_v38 = vld [vmem:[#allocation2 + $0x38] sm:$0x3] }
  0x86   :  { %v600_v7 = vadd.f32 %v592_v10, %v575_v24  ;;  %v649_v50 = vadd.f32 %v641_v31, %v623_v43  ;;  %v574_v16 = vadd.f32 %v566_v55, %v549_v52  ;;  %v418_v31 = vmul.f32 %v1005_v41, %v409_v61  ;;  %v1354_v17 = vld [vmem:[#allocation2 + $0x220] sm:$0xff]  ;;  %v510_v43 = vld [vmem:[#allocation2 + $0x208] sm:$0x3]  ;;  %v259_v61 = vld [vmem:[#allocation2 + $0x98] sm:$0x3] }
  0x87   :  { %684 = vst.msk [vmem:[%s1442_s3 + $0x8] sm:$0x3] %vm47_vm1, %v676_v58  ;;  %v576_v47 = vadd.f32 %v568_v40, %v551_v6  ;;  %v593_v30 = vmul.f32 %v1327_v59, %v1099_v27  ;;  %v469_v54 = vmul.f32 %v1021_v49, %v460_v5  ;;  %v643_v40 = vmul.f32 %v1102_v28, %v1306_v25 }
  0x88   :  { %v626_v2 = vadd.f32 %v1290_v57, %v600_v7  ;;  %v675_v55 = vadd.f32 %v667_v19, %v649_v50  ;;  %v599_v20 = vadd.f32 %v591_v14, %v574_v16  ;;  %v426_v21 = vadd.f32 %v418_v31, %v400_v11  ;;  %v284_v11 = vld [vmem:[#allocation2 + $0xf8] sm:$0x3] }
  0x89   :  { %v444_v57 = vmul.f32 %v1008_v42, %v435_v51  ;;  %v601_v24 = vadd.f32 %v593_v30, %v576_v47  ;;  %v619_v10 = vmul.f32 %v1051_v0, %v1336_v32  ;;  %v669_v52 = vmul.f32 %v1132_v60, %v1327_v59  ;;  %v309_v47 = vld [vmem:[#allocation2 + $0x48] sm:$0x3]  ;;  %v560_v30 = vld [vmem:[#allocation2 + $0x1b8] sm:$0x3] }
  0x8a   :  { %v652_v23 = vadd.f32 %v644_v56, %v626_v2  ;;  %683 = vst.msk [vmem:[%s1442_s3] sm:$0xff] %vm45_vm0, %v675_v55  ;;  %v625_v22 = vadd.f32 %v1269_v33, %v599_v20  ;;  %v494_v45 = vmul.f32 %v1045_v62, %v485_v44  ;;  %v645_v58 = vmul.f32 %v1102_v28, %v1341_v48  ;;  %v535_v2 = vld [vmem:[#allocation2 + $0x158] sm:$0x3]  ;;  %v384_v20 = vld [vmem:[#allocation2 + $0x50] sm:$0xff] }
  0x8b   :  { %v452_v46 = vadd.f32 %v444_v57, %v426_v21  ;;  %v627_v19 = vadd.f32 %v619_v10, %v601_v24  ;;  %v275_v14 = vadd.f32 %v1120_v53, %v1054_v1  ;;  %v671_v7 = vmul.f32 %v1132_v60, %v1354_v17  ;;  %v410_v21 = vld [vmem:[#allocation2 + $0xb0] sm:$0xff]  ;;  %v585_v57 = vld [vmem:[#allocation2 + $0x218] sm:$0x3] }
  0x8c   :  { %v678_v4 = vadd.f32 %v670_v9, %v652_v23  ;;  %v651_v33 = vadd.f32 %v643_v40, %v625_v22  ;;  %v519_v16 = vmul.f32 %v1075_v13, %v510_v43  ;;  %v317_v6 = vmul.f32 %v981_v29, %v1196_v12  ;;  %v1445_v9 = vld [vmem:[#allocation6_spill] sm:$0xff]  ;;  %v334_v40 = vld [vmem:[#allocation2 + $0xa8] sm:$0x3] }
  0x8d   :  { %v477_v50 = vadd.f32 %v469_v54, %v452_v46  ;;  %v653_v5 = vadd.f32 %v645_v58, %v627_v19  ;;  %v300_v1 = vadd.f32 %v1194_v34, %v275_v14  ;;  %v342_v53 = vmul.f32 %v1214_v8, %v991_v35  ;;  %v637_v58 = vld [vmem:[#allocation2 + $0x1c8] sm:$0x3] }
  0x8e   :  { %686 = vst.msk [vmem:[%s1442_s3 + $0x18] sm:$0x3] %vm47_vm1, %v678_v4  ;;  %v677_v51 = vadd.f32 %v669_v52, %v651_v33  ;;  %v243_v56 = vmul.f32 %v915_v3, %v234_v38  ;;  %v268_v31 = vmul.f32 %v1445_v9, %v259_v61  ;;  %v367_v34 = vmul.f32 %v1221_v18, %v994_v36  ;;  %v436_v18 = vld [vmem:[#allocation2 + $0x110] sm:$0xff]  ;;  %v611_v52 = vld [vmem:[#allocation2 + $0x168] sm:$0x3] }
  0x8f   :  { %v502_v55 = vadd.f32 %v494_v45, %v477_v50  ;;  %v679_v12 = vadd.f32 %v671_v7, %v653_v5  ;;  %v325_v44 = vadd.f32 %v317_v6, %v300_v1  ;;  %v293_v8 = vmul.f32 %v942_v15, %v284_v11  ;;  %v359_v45 = vld [vmem:[#allocation2 + $0x108] sm:$0x3]  ;;  %v385_v50 = vld [vmem:[#allocation2 + $0x58] sm:$0x3] }
  0x90   :  { %685 = vst.msk [vmem:[%s1442_s3 + $0x10] sm:$0xff] %vm45_vm0, %v677_v51  ;;  %v544_v3 = vmul.f32 %v1048_v63, %v535_v2  ;;  %v393_v22 = vmul.f32 %v997_v37, %v384_v20  ;;  %v569_v10 = vmul.f32 %v1096_v26, %v560_v30  ;;  %v276_v43 = vadd.f32 %v268_v31, %v243_v56  ;;  %v663_v51 = vld [vmem:[#allocation2 + $0x228] sm:$0x3]  ;;  %v411_v1 = vld [vmem:[#allocation2 + $0xb8] sm:$0x3] }
  0x91   :  { %v527_v23 = vadd.f32 %v519_v16, %v502_v55  ;;  %687 = vst.msk [vmem:[%s1442_s3 + $0x20] sm:$0xff] %vm45_vm0, %v679_v12  ;;  %v350_v54 = vadd.f32 %v342_v53, %v325_v44  ;;  %v318_v15 = vmul.f32 %v981_v29, %v309_v47  ;;  %v419_v46 = vmul.f32 %v1005_v41, %v410_v21  ;;  %v437_v20 = vld [vmem:[#allocation2 + $0x118] sm:$0x3] }
  0x92   :  { %v594_v61 = vmul.f32 %v1099_v27, %v585_v57  ;;  %v301_v33 = vadd.f32 %v293_v8, %v276_v43  ;;  %v343_v19 = vmul.f32 %v991_v35, %v334_v40  ;;  %v445_v7 = vmul.f32 %v1008_v42, %v436_v18  ;;  %v487_v21 = vld [vmem:[#allocation2 + $0x1b8] sm:$0x3]  ;;  %v612_v40 = vld [vmem:[#allocation2 + $0x170] sm:$0xff]  ;;  %v537_v18 = vld [vmem:[#allocation2 + $0x168] sm:$0x3] }
  0x93   :  { %v552_v24 = vadd.f32 %v544_v3, %v527_v23  ;;  %v375_v4 = vadd.f32 %v367_v34, %v350_v54  ;;  %v620_v6 = vmul.f32 %v1051_v0, %v611_v52  ;;  %v368_v11 = vmul.f32 %v994_v36, %v359_v45  ;;  %v462_v34 = vld [vmem:[#allocation2 + $0x158] sm:$0x3]  ;;  %v638_v43 = vld [vmem:[#allocation2 + $0x1d0] sm:$0xff] }
  0x94   :  { %v326_v29 = vadd.f32 %v318_v15, %v301_v33  ;;  %v470_v2 = vmul.f32 %v1244_v39, %v1021_v49  ;;  %v646_v35 = vmul.f32 %v1102_v28, %v637_v58  ;;  %v394_v9 = vmul.f32 %v997_v37, %v385_v50  ;;  %v664_v45 = vld [vmem:[#allocation2 + $0x230] sm:$0xff]  ;;  %v587_v33 = vld [vmem:[#allocation2 + $0x228] sm:$0x3] }
  0x95   :  { %v577_v38 = vadd.f32 %v569_v10, %v552_v24  ;;  %v401_v14 = vadd.f32 %v393_v22, %v375_v4  ;;  %v495_v55 = vmul.f32 %v1306_v25, %v1045_v62  ;;  %v672_v36 = vmul.f32 %v1132_v60, %v663_v51  ;;  %v512_v22 = vld [vmem:[#allocation2 + $0x218] sm:$0x3] }
  0x96   :  { %v351_v56 = vadd.f32 %v343_v19, %v326_v29  ;;  %v420_v30 = vmul.f32 %v1005_v41, %v411_v1  ;;  %v520_v39 = vmul.f32 %v1327_v59, %v1075_v13  ;;  %v446_v37 = vmul.f32 %v1008_v42, %v437_v20  ;;  %v665_v51 = vld [vmem:[#allocation2 + $0x238] sm:$0x3] }
  0x97   :  { %v602_v16 = vadd.f32 %v594_v61, %v577_v38  ;;  %v427_v5 = vadd.f32 %v419_v46, %v401_v14  ;;  %v545_v25 = vmul.f32 %v1336_v32, %v1048_v63  ;;  %v471_v57 = vmul.f32 %v1021_v49, %v462_v34  ;;  %v562_v46 = vld [vmem:[#allocation2 + $0x1c8] sm:$0x3] }
  0x98   :  { %v376_v12 = vadd.f32 %v368_v11, %v351_v56  ;;  %v570_v59 = vmul.f32 %v1341_v48, %v1096_v26  ;;  %v496_v24 = vmul.f32 %v1045_v62, %v487_v21  ;;  %v595_v32 = vmul.f32 %v1354_v17, %v1099_v27 }
  0x99   :  { %v628_v53 = vadd.f32 %v620_v6, %v602_v16  ;;  %v453_v31 = vadd.f32 %v445_v7, %v427_v5  ;;  %v521_v52 = vmul.f32 %v1075_v13, %v512_v22  ;;  %v621_v49 = vmul.f32 %v1051_v0, %v612_v40  ;;  %v613_v7 = vld [vmem:[#allocation2 + $0x178] sm:$0x3] }
  0x9a   :  { %v402_v23 = vadd.f32 %v394_v9, %v376_v12  ;;  %v546_v38 = vmul.f32 %v1048_v63, %v537_v18  ;;  %v647_v62 = vmul.f32 %v1102_v28, %v638_v43  ;;  %v571_v17 = vmul.f32 %v1096_v26, %v562_v46  ;;  %v639_v6 = vld [vmem:[#allocation2 + $0x1d8] sm:$0x3] }
  0x9b   :  { %v654_v47 = vadd.f32 %v646_v35, %v628_v53  ;;  %v478_v44 = vadd.f32 %v470_v2, %v453_v31  ;;  %v673_v14 = vmul.f32 %v1132_v60, %v664_v45  ;;  %v596_v50 = vmul.f32 %v1099_v27, %v587_v33 }
  0x9c   :  { %v428_v41 = vadd.f32 %v420_v30, %v402_v23  ;;  %v622_v11 = vmul.f32 %v1051_v0, %v613_v7  ;;  %v648_v2 = vmul.f32 %v1102_v28, %v639_v6  ;;  %v674_v1 = vmul.f32 %v1132_v60, %v665_v51 }
  0x9d   :  { %v680_v8 = vadd.f32 %v672_v36, %v654_v47  ;;  %v503_v3 = vadd.f32 %v495_v55, %v478_v44 }
  0x9e   :  { %v454_v42 = vadd.f32 %v446_v37, %v428_v41 }
  0x9f   :  { %688 = vst.msk [vmem:[%s1442_s3 + $0x28] sm:$0x3] %vm47_vm1, %v680_v8  ;;  %v528_v54 = vadd.f32 %v520_v39, %v503_v3 }
  0xa0   :  { %v479_v15 = vadd.f32 %v471_v57, %v454_v42 }
  0xa1   :  { %v553_v10 = vadd.f32 %v545_v25, %v528_v54 }
  0xa2   :  { %v504_v48 = vadd.f32 %v496_v24, %v479_v15 }
  0xa3   :  { %v578_v4 = vadd.f32 %v570_v59, %v553_v10 }
  0xa4   :  { %v529_v19 = vadd.f32 %v521_v52, %v504_v48 }
  0xa5   :  { %v603_v61 = vadd.f32 %v595_v32, %v578_v4 }
  0xa6   :  { %v554_v13 = vadd.f32 %v546_v38, %v529_v19 }
  0xa7   :  { %v629_v58 = vadd.f32 %v621_v49, %v603_v61 }
  0xa8   :  { %v579_v29 = vadd.f32 %v571_v17, %v554_v13 }
  0xa9   :  { %v655_v16 = vadd.f32 %v647_v62, %v629_v58 }
  0xaa   :  { %v604_v5 = vadd.f32 %v596_v50, %v579_v29 }
  0xab   :  { %v681_v63 = vadd.f32 %v673_v14, %v655_v16 }
  0xac   :  { %v630_v26 = vadd.f32 %v622_v11, %v604_v5 }
  0xad   :  { %689 = vst.msk [vmem:[%s1442_s3 + $0x30] sm:$0xff] %vm45_vm0, %v681_v63 }
  0xae   :  { %v656_v53 = vadd.f32 %v648_v2, %v630_v26 }
  0xb0   :  { %v682_v27 = vadd.f32 %v674_v1, %v656_v53 }
  0xb2   :  { %690 = vst.msk [vmem:[%s1442_s3 + $0x38] sm:$0x3] %vm47_vm1, %v682_v27 }
  0xb3   :  { %695 = vsyncpa [#allocation4], 1 }

</bundles_post_ra>
